<compile_context>
chip_gen: v5e
topology: v5e:2x2
jax: 0.10.0
libtpu: 0.0.40
codegen_flags: <defaults>
</compile_context>

<pallas_src>
import jax
import jax.numpy as jnp
from jax.experimental import pallas as pl
from jax.experimental.pallas import tpu as pltpu

LN_EPS = 1e-5  # torch.nn.LayerNorm default


def relation_logits_kernel(xn_ref, xnT_ref, wblk_ref, out_ref):
    """One grid step = one group of Rb relations.

    xn_ref   : (E, H)      LN(LN(event_embs)), bf16, resident across the grid
    xnT_ref  : (H, E)      its transpose, bf16, resident (no per-step XLU transpose)
    wblk_ref : (1, H, Rb*H) bf16, streamed; column block r is W[g*Rb + r]
    out_ref  : (1, E, Rb*E) f32 logits slab for this relation group
    """
    xn = xn_ref[...]                     # (E, H) bf16
    xnT = xnT_ref[...]                   # (H, E) bf16
    wblk = wblk_ref[0]                   # (H, Rb*H) bf16

    E, H = xn_ref.shape
    Rb = wblk_ref.shape[2] // H

    # Dominant matmul: N = Rb*H on the MXU lane axis (lane-dense), f32 accumulate.
    xw = jnp.dot(xn, wblk, preferred_element_type=jnp.float32)   # (E, Rb*H)

    # Small per-relation matmuls (E*H*E flops each), static unroll over Rb.
    outs = []
    for r in range(Rb):
        pre_r = xw[:, r * H:(r + 1) * H].astype(xnT.dtype)        # (E, H) bf16
        outs.append(jnp.dot(pre_r, xnT,
                            preferred_element_type=jnp.float32))  # (E, E) f32

    # Single lane-dense slab store for the whole block.
    out_ref[0] = jnp.concatenate(outs, axis=-1)                   # (E, Rb*E)


def _pick_rb(num_relations, hidden, itemsize=2, w_budget_bytes=8 << 20):
    """Largest divisor of R whose double-buffered W block fits a small VMEM budget,
    preferring Rb*H a multiple of 256 (v6e/v7x MXU width)."""
    fitting = [rb for rb in range(1, num_relations + 1)
               if num_relations % rb == 0
               and 2 * rb * hidden * hidden * itemsize <= w_budget_bytes]
    if not fitting:
        return 1
    pref = [rb for rb in fitting if (rb * hidden) % 256 == 0]
    return max(pref) if pref else max(fitting)


def make_relation_logits_pallas(event_embs, gamma, beta, W):
    """event_embs: (E, H), gamma/beta: (H,), W: (R, H, H) -> (E, E, R) f32."""
    E, H = event_embs.shape
    R = W.shape[0]

    # ---- hoisted, relation-invariant work (done once, outside the grid) ----
    # PyTorch applies self.norm to all hidden states, gathers, then norms again.
    # LayerNorm is row-wise, so norm(H)[ids] == norm(H[ids]); gather happens in
    # the caller and the double norm is applied here, once.
    x = event_embs.astype(jnp.float32)

    def ln(v):
        mu = jnp.mean(v, axis=-1, keepdims=True)
        var = jnp.mean(jnp.square(v - mu), axis=-1, keepdims=True)
        return (v - mu) * jax.lax.rsqrt(var + LN_EPS) * gamma + beta

    xn = ln(ln(x))
    xn_bf = xn.astype(jnp.bfloat16)          # MXU inputs in bf16, f32 accumulate
    xnT_bf = xn_bf.T                         # transpose precomputed once

    # ---- relation blocking: Rb relations per grid step ----
    Rb = _pick_rb(R, H)
    G = R // Rb
    # W_blk[g][:, r*H:(r+1)*H] = W[g*Rb + r]
    W_blk = jnp.transpose(W.reshape(G, Rb, H, H), (0, 2, 1, 3)).reshape(G, H, Rb * H)
    W_blk = W_blk.astype(jnp.bfloat16)

    # Deepen W pipelining only when the grid is deep enough for it to matter.
    if G >= 3:
        w_spec = pl.BlockSpec((1, H, Rb * H), lambda g: (g, 0, 0),
                              pipeline_mode=pl.Buffered(3))
    else:
        w_spec = pl.BlockSpec((1, H, Rb * H), lambda g: (g, 0, 0))

    out = pl.pallas_call(
        relation_logits_kernel,
        out_shape=jax.ShapeDtypeStruct((G, E, Rb * E), jnp.float32),
        grid_spec=pltpu.PrefetchScalarGridSpec(
            num_scalar_prefetch=0,
            grid=(G,),
            in_specs=[
                pl.BlockSpec((E, H), lambda g: (0, 0)),   # xn, resident
                pl.BlockSpec((H, E), lambda g: (0, 0)),   # xn^T, resident
                w_spec,                                   # W block, streamed
            ],
            out_specs=pl.BlockSpec((1, E, Rb * E), lambda g: (g, 0, 0)),
        ),
        compiler_params=pltpu.CompilerParams(
            dimension_semantics=("parallel",)),
    )(xn_bf, xnT_bf, W_blk)

    # out[g, i, r*E + j] = logits[g*Rb + r, i, j]; the module contract requires
    # (E, E, R) (== logits.permute(1, 2, 0)); this rearrangement is tiny (E*E*R).
    logits = out.reshape(G, E, Rb, E)
    logits = jnp.transpose(logits, (1, 3, 0, 2)).reshape(E, E, R)
    return logits


def init_params(key, vocab_size, hidden, num_relations):
    k_emb, k_proj, k_w = jax.random.split(key, 3)
    return {
        # synthetic backbone params
        "embed": jax.random.normal(k_emb, (vocab_size, hidden), jnp.float32) * 0.02,
        "proj": jax.random.normal(k_proj, (hidden, hidden), jnp.float32) * 0.02,
        "proj_b": jnp.zeros((hidden,), jnp.float32),
        # nn.LayerNorm(hidden) init
        "ln_gamma": jnp.ones((hidden,), jnp.float32),
        "ln_beta": jnp.zeros((hidden,), jnp.float32),
        # self.W = torch.randn(num_relations, hidden, hidden) / hidden
        "W": jax.random.normal(k_w, (num_relations, hidden, hidden), jnp.float32)
             / hidden,
    }


def forward(params, input_ids, event_token_ids):
    # TODO(synk): the pretrained AutoModel backbone is not reproducible here; it
    # is replaced by a deterministic synthetic encoder (embedding + tanh dense)
    # that yields last_hidden_state of shape (S, H).
    h = params["embed"][input_ids]                       # (S, H)
    h = jnp.tanh(h @ params["proj"] + params["proj_b"])  # (S, H)

    # gather of event token rows (glue); norms hoisted + bilinear logits in Pallas
    event_embs = h[event_token_ids]                      # (E, H)
    return make_relation_logits_pallas(
        event_embs, params["ln_gamma"], params["ln_beta"], params["W"])


def forward_reference(params, input_ids, event_token_ids):
    """Pure-JAX f32 reference mirroring the PyTorch forward exactly."""
    h = params["embed"][input_ids]
    h = jnp.tanh(h @ params["proj"] + params["proj_b"])

    def ln(v):
        mu = jnp.mean(v, axis=-1, keepdims=True)
        var = jnp.mean(jnp.square(v - mu), axis=-1, keepdims=True)
        return ((v - mu) * jax.lax.rsqrt(var + LN_EPS)
                * params["ln_gamma"] + params["ln_beta"])

    h = ln(h)                                 # norm over all hidden states
    e = h[event_token_ids]                    # gather event embeddings
    e = ln(e)                                 # norm again
    W = params["W"]                           # (R, H, H)
    e1 = e[None, :, :]                        # (1, E, H)
    pre = W @ jnp.swapaxes(e1, -1, -2)        # (R, H, E)
    logits = e1 @ pre                         # (R, E, E)
    return jnp.transpose(logits, (1, 2, 0))   # (E, E, R)


if __name__ == "__main__":
    VOCAB, SEQ, HIDDEN, NUM_REL, NUM_EVENTS = 50, 16, 128, 4, 8

    key = jax.random.PRNGKey(0)
    k_params, k_ids, k_ev = jax.random.split(key, 3)

    params = init_params(k_params, VOCAB, HIDDEN, NUM_REL)
    input_ids = jax.random.randint(k_ids, (SEQ,), 0, VOCAB, dtype=jnp.int32)
    event_token_ids = jax.random.permutation(k_ev, SEQ)[:NUM_EVENTS].astype(jnp.int32)

    out = forward(params, input_ids, event_token_ids)
    out = jax.block_until_ready(out)

    ref = forward_reference(params, input_ids, event_token_ids)
    assert out.shape == (NUM_EVENTS, NUM_EVENTS, NUM_REL), out.shape
    # Tolerance relaxed vs. the pure-f32 reference because the kernel feeds the
    # MXU bf16 inputs (f32 accumulation), per the performance review.
    assert jnp.allclose(out, ref, atol=5e-2, rtol=5e-2), "mismatch vs reference"

    print("KERNEL_OK")
</pallas_src>

<mosaic_0001>
module attributes {stable_mosaic.version = 11 : i64} {
  func.func @relation_logits_kernel(%arg0: i32, %arg1: memref<8x128xbf16, #tpu.memory_space<vmem>>, %arg2: memref<128x8xbf16, #tpu.memory_space<vmem>>, %arg3: memref<1x128x512xbf16, #tpu.memory_space<vmem>>, %arg4: memref<1x8x32xf32, #tpu.memory_space<vmem>>) attributes {dimension_semantics = [#tpu.dimension_semantics<parallel>], iteration_bounds = array<i64: 1>, scalar_prefetch = 0 : i64, scratch_operands = 0 : i64, tpu.core_type = #tpu.core_type<tc>, window_params = [{pipeline_mode = #tpu.pipeline_mode<synchronous>, transform_indices = @transform_0, window_bounds = array<i64: 8, 128>}, {pipeline_mode = #tpu.pipeline_mode<synchronous>, transform_indices = @transform_1, window_bounds = array<i64: 128, 8>}, {transform_indices = @transform_2, window_bounds = array<i64: 1, 128, 512>}, {transform_indices = @transform_3, window_bounds = array<i64: 1, 8, 32>}]} {
    %c0 = arith.constant 0 : index
    %c0_0 = arith.constant 0 : index
    %0 = vector.load %arg1[%c0, %c0_0] : memref<8x128xbf16, #tpu.memory_space<vmem>>, vector<8x128xbf16>
    %c0_1 = arith.constant 0 : index
    %c0_2 = arith.constant 0 : index
    %1 = vector.load %arg2[%c0_1, %c0_2] : memref<128x8xbf16, #tpu.memory_space<vmem>>, vector<128x8xbf16>
    %c0_3 = arith.constant 0 : index
    %c0_4 = arith.constant 0 : index
    %c0_5 = arith.constant 0 : index
    %2 = vector.load %arg3[%c0_3, %c0_4, %c0_5] : memref<1x128x512xbf16, #tpu.memory_space<vmem>>, vector<1x128x512xbf16>
    %3 = vector.shape_cast %2 : vector<1x128x512xbf16> to vector<128x512xbf16>
    %cst = arith.constant dense<0.000000e+00> : vector<8x512xf32>
    %4 = tpu.matmul %0, %3, %cst {dimension_numbers = #tpu.dot_dimension_numbers<[1], [0], [0], [1], [0, 0, 1, 1], [], []>} : vector<8x128xbf16>, vector<128x512xbf16>, vector<8x512xf32> -> vector<8x512xf32>
    %5 = vector.extract_strided_slice %4 {offsets = [0, 0], sizes = [8, 128], strides = [1, 1]} : vector<8x512xf32> to vector<8x128xf32>
    %6 = arith.truncf %5 : vector<8x128xf32> to vector<8x128xbf16>
    %cst_6 = arith.constant dense<0.000000e+00> : vector<8x8xf32>
    %7 = tpu.matmul %6, %1, %cst_6 {dimension_numbers = #tpu.dot_dimension_numbers<[1], [0], [0], [1], [0, 0, 1, 1], [], []>} : vector<8x128xbf16>, vector<128x8xbf16>, vector<8x8xf32> -> vector<8x8xf32>
    %8 = vector.extract_strided_slice %4 {offsets = [0, 128], sizes = [8, 128], strides = [1, 1]} : vector<8x512xf32> to vector<8x128xf32>
    %9 = arith.truncf %8 : vector<8x128xf32> to vector<8x128xbf16>
    %cst_7 = arith.constant dense<0.000000e+00> : vector<8x8xf32>
    %10 = tpu.matmul %9, %1, %cst_7 {dimension_numbers = #tpu.dot_dimension_numbers<[1], [0], [0], [1], [0, 0, 1, 1], [], []>} : vector<8x128xbf16>, vector<128x8xbf16>, vector<8x8xf32> -> vector<8x8xf32>
    %11 = vector.extract_strided_slice %4 {offsets = [0, 256], sizes = [8, 128], strides = [1, 1]} : vector<8x512xf32> to vector<8x128xf32>
    %12 = arith.truncf %11 : vector<8x128xf32> to vector<8x128xbf16>
    %cst_8 = arith.constant dense<0.000000e+00> : vector<8x8xf32>
    %13 = tpu.matmul %12, %1, %cst_8 {dimension_numbers = #tpu.dot_dimension_numbers<[1], [0], [0], [1], [0, 0, 1, 1], [], []>} : vector<8x128xbf16>, vector<128x8xbf16>, vector<8x8xf32> -> vector<8x8xf32>
    %14 = vector.extract_strided_slice %4 {offsets = [0, 384], sizes = [8, 128], strides = [1, 1]} : vector<8x512xf32> to vector<8x128xf32>
    %15 = arith.truncf %14 : vector<8x128xf32> to vector<8x128xbf16>
    %cst_9 = arith.constant dense<0.000000e+00> : vector<8x8xf32>
    %16 = tpu.matmul %15, %1, %cst_9 {dimension_numbers = #tpu.dot_dimension_numbers<[1], [0], [0], [1], [0, 0, 1, 1], [], []>} : vector<8x128xbf16>, vector<128x8xbf16>, vector<8x8xf32> -> vector<8x8xf32>
    %17 = tpu.concatenate %7, %10, %13, %16 in 1 : vector<8x8xf32>, vector<8x8xf32>, vector<8x8xf32>, vector<8x8xf32> -> vector<8x32xf32>
    %c0_10 = arith.constant 0 : index
    %c0_11 = arith.constant 0 : index
    %c0_12 = arith.constant 0 : index
    %18 = vector.load %arg4[%c0_10, %c0_11, %c0_12] : memref<1x8x32xf32, #tpu.memory_space<vmem>>, vector<1x8x32xf32>
    %19 = vector.shape_cast %18 : vector<1x8x32xf32> to vector<8x32xf32>
    %20 = vector.shape_cast %17 : vector<8x32xf32> to vector<1x8x32xf32>
    tpu.vector_store %arg4[%c0_10, %c0_11, %c0_12], %20 {strides = array<i32>} : memref<1x8x32xf32, #tpu.memory_space<vmem>>, vector<1x8x32xf32>,
    return
  }
  func.func @transform_0(%arg0: i32) -> (i32, i32) {
    %c0_i32 = arith.constant 0 : i32
    %c0_i32_0 = arith.constant 0 : i32
    %c0_i32_1 = arith.constant 0 : i32
    return %c0_i32, %c0_i32_0 : i32, i32
  }
  func.func @transform_1(%arg0: i32) -> (i32, i32) {
    %c0_i32 = arith.constant 0 : i32
    %c0_i32_0 = arith.constant 0 : i32
    %c0_i32_1 = arith.constant 0 : i32
    return %c0_i32, %c0_i32_0 : i32, i32
  }
  func.func @transform_2(%arg0: i32) -> (i32, i32, i32) {
    %c0_i32 = arith.constant 0 : i32
    %c0_i32_0 = arith.constant 0 : i32
    %c0_i32_1 = arith.constant 0 : i32
    return %arg0, %c0_i32, %c0_i32_0 : i32, i32, i32
  }
  func.func @transform_3(%arg0: i32) -> (i32, i32, i32) {
    %c0_i32 = arith.constant 0 : i32
    %c0_i32_0 = arith.constant 0 : i32
    %c0_i32_1 = arith.constant 0 : i32
    return %arg0, %c0_i32, %c0_i32_0 : i32, i32, i32
  }
}

</mosaic_0001>

<bundles_post_ra>
// kernel: tpu_custom_call.1
= control target key start
LH: loop header
LB: loop body
LE: loop exit
PB: predicated region body
PF: predicated region fallthrough
CT: control target
= control target key end

     0   :  { %8 = vsyncpa [#allocation3], 0  ;;  %s752_s0 = inlined_call_operand.vmem [shape: bf16[8,128], index: 0, kind: input, shape index: {}]   ;;  %s753_s1 = inlined_call_operand.vmem [shape: bf16[128,8], index: 1, kind: input, shape index: {}]   ;;  %s754_s2 = inlined_call_operand.hbm [shape: bf16[1,128,512], index: 2, kind: input, shape index: {}]   ;;  %s755_s3 = inlined_call_operand.hbm [shape: f32[1,8,32], index: 3, kind: output, shape index: {}]  }
   0x1   :  { %9 = vsyncpa [#allocation4], 0  ;;  %s18_s14 = sshll.u32 %s754_s2, 4  ;;  %s691_s15 = smov [#allocation2]   ;;  %s19_s14 = int_to_ptr.hbm [resolvable:$true] %s18_s14 }
   0x2   :  { %s20_s16 = sshll.u32 %s691_s15, 4  ;;  %s692_s17 = smov 256   ;;  %s21_s16 = int_to_ptr.vmem [resolvable:$true] %s20_s16 }
   0x3   :  { %s693_s18 = smov 16  }
   0x4   :  { %26 = dma.hbm_to_vmem [thread:$0]  %s19_s14, 4096, %s21_s16, [#allocation3], %s692_s17, %s692_s17, %s693_s18  }
   0x5   :  { %687 = dma.done.wait [#allocation3], 4096  }
   0x6   :  { %688 = vsyncadd [#allocation3], 4294963200  ;;  %v629_v0 = vld [vmem:[#allocation2 + $0xe4] sm:$0xf]  ;;  %v549_v1 = vld [vmem:[#allocation2 + $0xf0] sm:$0xf0] }
   0x7   :  { %v555_v2 = vld [vmem:[#allocation2 + $0xe8] sm:$0xf]  ;;  %v552_v3 = vor.u32 %v629_v0, %v549_v1  ;;  %v632_v4 = vld [vmem:[#allocation2 + $0xf4] sm:$0xf0]  ;;  %v630_v5 = vld [vmem:[#allocation2 + $0xec] sm:$0xf] }
   0x8   :  { %v557_v6 = vld [vmem:[#allocation2 + $0xf8] sm:$0xf0]  ;;  %v556_v7 = vor.u32 %v632_v4, %v555_v2  ;;  %v625_v9 = vld [vmem:[#allocation2 + $0xc4] sm:$0xf]  ;;  %v533_v10 = vld [vmem:[#allocation2 + $0xd0] sm:$0xf0] }
   0x9   :  { %v560_v8 = vor.u32 %v630_v5, %v557_v6  ;;  %v539_v11 = vld [vmem:[#allocation2 + $0xc8] sm:$0xf]  ;;  %253 = vmatpush.bf16.msra.mxu1 %v552_v3  ;;  %v536_v12 = vor.u32 %v625_v9, %v533_v10  ;;  %v628_v13 = vld [vmem:[#allocation2 + $0xd4] sm:$0xf0]  ;;  %v626_v14 = vld [vmem:[#allocation2 + $0xcc] sm:$0xf] }
   0xa   :  { %v541_v15 = vld [vmem:[#allocation2 + $0xd8] sm:$0xf0]  ;;  %266 = vmatpush.bf16.msra.mxu2 %v556_v7  ;;  %v540_v16 = vor.u32 %v628_v13, %v539_v11  ;;  %v621_v18 = vld [vmem:[#allocation2 + $0xa4] sm:$0xf]  ;;  %v517_v19 = vld [vmem:[#allocation2 + $0xb0] sm:$0xf0] }
   0xb   :  { %279 = vmatpush.bf16.msra.mxu3 %v560_v8  ;;  %v544_v17 = vor.u32 %v626_v14, %v541_v15  ;;  %v523_v20 = vld [vmem:[#allocation2 + $0xa8] sm:$0xf]  ;;  %v624_v21 = vld [vmem:[#allocation2 + $0xb4] sm:$0xf0]  ;;  %v622_v22 = vld [vmem:[#allocation2 + $0xac] sm:$0xf]  ;;  %v520_v24 = vor.u32 %v621_v18, %v517_v19 }
   0xc   :  { %v525_v23 = vld [vmem:[#allocation2 + $0xb8] sm:$0xf0]  ;;  %v524_v25 = vor.u32 %v624_v21, %v523_v20  ;;  %v617_v27 = vld [vmem:[#allocation2 + $0x84] sm:$0xf]  ;;  %v501_v28 = vld [vmem:[#allocation2 + $0x90] sm:$0xf0] }
   0xd   :  { %254 = vmatpush.bf16.msra.mxu1 %v536_v12  ;;  %v528_v26 = vor.u32 %v622_v22, %v525_v23  ;;  %v507_v29 = vld [vmem:[#allocation2 + $0x88] sm:$0xf]  ;;  %v620_v30 = vld [vmem:[#allocation2 + $0x94] sm:$0xf0]  ;;  %v618_v31 = vld [vmem:[#allocation2 + $0x8c] sm:$0xf]  ;;  %v504_v33 = vor.u32 %v617_v27, %v501_v28 }
   0xe   :  { %267 = vmatpush.bf16.msra.mxu2 %v540_v16  ;;  %v509_v32 = vld [vmem:[#allocation2 + $0x98] sm:$0xf0]  ;;  %v508_v34 = vor.u32 %v620_v30, %v507_v29  ;;  %v613_v36 = vld [vmem:[#allocation2 + $0x64] sm:$0xf]  ;;  %v485_v37 = vld [vmem:[#allocation2 + $0x70] sm:$0xf0] }
   0xf   :  { %280 = vmatpush.bf16.msra.mxu3 %v544_v17  ;;  %v512_v35 = vor.u32 %v618_v31, %v509_v32  ;;  %v491_v38 = vld [vmem:[#allocation2 + $0x68] sm:$0xf]  ;;  %v616_v39 = vld [vmem:[#allocation2 + $0x74] sm:$0xf0]  ;;  %v614_v40 = vld [vmem:[#allocation2 + $0x6c] sm:$0xf]  ;;  %v488_v43 = vor.u32 %v613_v36, %v485_v37 }
  0x10   :  { %v493_v41 = vld [vmem:[#allocation2 + $0x78] sm:$0xf0]  ;;  %v609_v42 = vld [vmem:[#allocation2 + $0x44] sm:$0xf]  ;;  %v469_v44 = vld [vmem:[#allocation2 + $0x50] sm:$0xf0]  ;;  %v492_v47 = vor.u32 %v616_v39, %v491_v38 }
  0x11   :  { %255 = vmatpush.bf16.msra.mxu1 %v520_v24  ;;  %v475_v45 = vld [vmem:[#allocation2 + $0x48] sm:$0xf]  ;;  %v612_v46 = vld [vmem:[#allocation2 + $0x54] sm:$0xf0]  ;;  %v496_v48 = vor.u32 %v614_v40, %v493_v41  ;;  %v610_v49 = vld [vmem:[#allocation2 + $0x4c] sm:$0xf]  ;;  %v472_v56 = vor.u32 %v609_v42, %v469_v44 }
  0x12   :  { %268 = vmatpush.bf16.msra.mxu2 %v524_v25  ;;  %v547_v50 = vld [vmem:[#allocation2 + $0xe0] sm:$0xf]  ;;  %v631_v51 = vld [vmem:[#allocation2 + $0xec] sm:$0xf0]  ;;  %v477_v52 = vld [vmem:[#allocation2 + $0x58] sm:$0xf0]  ;;  %v476_v60 = vor.u32 %v612_v46, %v475_v45 }
  0x13   :  { %281 = vmatpush.bf16.msra.mxu3 %v528_v26  ;;  %v548_v53 = vor.u32 %v631_v51, %v547_v50  ;;  %v531_v54 = vld [vmem:[#allocation2 + $0xc0] sm:$0xf]  ;;  %v627_v55 = vld [vmem:[#allocation2 + $0xcc] sm:$0xf0]  ;;  %v605_v57 = vld [vmem:[#allocation2 + $0x24] sm:$0xf]  ;;  %v480_v61 = vor.u32 %v610_v49, %v477_v52 }
  0x14   :  { %v453_v58 = vld [vmem:[#allocation2 + $0x30] sm:$0xf0]  ;;  %v532_v59 = vor.u32 %v627_v55, %v531_v54  ;;  %v459_v62 = vld [vmem:[#allocation2 + $0x28] sm:$0xf]  ;;  %v515_v63 = vld [vmem:[#allocation2 + $0xa0] sm:$0xf] }
  0x15   :  { %256 = vmatpush.bf16.msra.mxu1 %v504_v33  ;;  %240 = vmatpush.bf16.msra.mxu0 %v548_v53  ;;  %v623_v0 = vld [vmem:[#allocation2 + $0xac] sm:$0xf0]  ;;  %v608_v1 = vld [vmem:[#allocation2 + $0x34] sm:$0xf0]  ;;  %v606_v2 = vld [vmem:[#allocation2 + $0x2c] sm:$0xf]  ;;  %v456_v4 = vor.u32 %v605_v57, %v453_v58 }
  0x16   :  { %269 = vmatpush.bf16.msra.mxu2 %v508_v34  ;;  %v461_v3 = vld [vmem:[#allocation2 + $0x38] sm:$0xf0]  ;;  %v601_v5 = vld [vmem:[#allocation2 + $0x4] sm:$0xf]  ;;  %v437_v6 = vld [vmem:[#allocation2 + $0x10] sm:$0xf0]  ;;  %v516_v7 = vor.u32 %v623_v0, %v515_v63  ;;  %v460_v8 = vor.u32 %v608_v1, %v459_v62 }
  0x17   :  { %282 = vmatpush.bf16.msra.mxu3 %v512_v35  ;;  %v464_v9 = vor.u32 %v606_v2, %v461_v3  ;;  %v443_v10 = vld [vmem:[#allocation2 + $0x8] sm:$0xf]  ;;  %v499_v11 = vld [vmem:[#allocation2 + $0x80] sm:$0xf]  ;;  %v619_v12 = vld [vmem:[#allocation2 + $0x8c] sm:$0xf0]  ;;  %v440_v16 = vor.u32 %v601_v5, %v437_v6 }
  0x18   :  { %v604_v13 = vld [vmem:[#allocation2 + $0x14] sm:$0xf0]  ;;  %v602_v14 = vld [vmem:[#allocation2 + $0xc] sm:$0xf]  ;;  %v445_v15 = vld [vmem:[#allocation2 + $0x18] sm:$0xf0]  ;;  %v500_v17 = vor.u32 %v619_v12, %v499_v11 }
  0x19   :  { %257 = vmatpush.bf16.msra.mxu1 %v488_v43  ;;  %241 = vmatpush.bf16.msra.mxu0 %v532_v59  ;;  %v444_v18 = vor.u32 %v604_v13, %v443_v10  ;;  %v448_v19 = vor.u32 %v602_v14, %v445_v15  ;;  %v600_v20 = vld [vmem:[%s753_s1 + $0x38] sm:$0xff]  ;;  %v483_v21 = vld [vmem:[#allocation2 + $0x60] sm:$0xf]  ;;  %v615_v22 = vld [vmem:[#allocation2 + $0x6c] sm:$0xf0]  ;;  %s695_s8 = smov 24  }
  0x1a   :  { %270 = vmatpush.bf16.msra.mxu2 %v492_v47  ;;  %v31_v23 = vld [vmem:[%s752_s0] sm:$0xf]  ;;  %v484_v24 = vor.u32 %v615_v22, %v483_v21  ;;  %v599_v25 = vld [vmem:[%s753_s1 + $0x30] sm:$0xff]  ;;  %v598_v29 = vld [vmem:[%s753_s1 + $0x28] sm:$0xff]  ;;  %vm408_vm0 = vcmask 64512   ;;  %vm410_vm1 = vcmask 130048  }
  0x1b   :  { %283 = vmatpush.bf16.msra.mxu3 %v496_v48  ;;  %v467_v26 = vld [vmem:[#allocation2 + $0x40] sm:$0xf]  ;;  %v611_v27 = vld [vmem:[#allocation2 + $0x4c] sm:$0xf0]  ;;  %v596_v37 = vld [vmem:[%s753_s1 + $0x18] sm:$0xff]  ;;  %s696_s9 = smov [#allocation5]  }
  0x1c   :  { %v468_v28 = vor.u32 %v611_v27, %v467_v26  ;;  %v451_v30 = vld [vmem:[#allocation2 + $0x20] sm:$0xf]  ;;  %v607_v31 = vld [vmem:[#allocation2 + $0x2c] sm:$0xf0]  ;;  %v594_v39 = vld [vmem:[%s753_s1 + $0x8] sm:$0xff]  ;;  %s421_s10 = sshll.u32 %s696_s9, 4  ;;  %s422_s10 = int_to_ptr.vmem [resolvable:$true] %s421_s10 }
  0x1d   :  { %258 = vmatpush.bf16.msra.mxu1 %v472_v56  ;;  %242 = vmatpush.bf16.msra.mxu0 %v516_v7  ;;  %v452_v32 = vor.u32 %v607_v31, %v451_v30  ;;  %v597_v33 = vld [vmem:[%s753_s1 + $0x20] sm:$0xff]  ;;  %v603_v35 = vld [vmem:[#allocation2 + $0xc] sm:$0xf0]  ;;  %s423_s13 = sshll.u32 %s755_s3, 4  ;;  %vm412_vm2 = vcmask 195584   ;;  %vm414_vm3 = vcmask 261120   ;;  %s424_s13 = int_to_ptr.hbm [resolvable:$true] %s423_s13 }
  0x1e   :  { %271 = vmatpush.bf16.msra.mxu2 %v476_v60  ;;  %v435_v34 = vld [vmem:[#allocation2] sm:$0xf]  ;;  %v595_v38 = vld [vmem:[%s753_s1 + $0x10] sm:$0xff] }
  0x1f   :  { %284 = vmatpush.bf16.msra.mxu3 %v480_v61  ;;  %v436_v36 = vor.u32 %v603_v35, %v435_v34  ;;  %v593_v40 = vld [vmem:[%s753_s1] sm:$0xff]  ;;  %s694_s1 = smov 8  }
  0x21   :  { %259 = vmatpush.bf16.msra.mxu1 %v456_v4  ;;  %243 = vmatpush.bf16.msra.mxu0 %v500_v17 }
  0x22   :  { %272 = vmatpush.bf16.msra.mxu2 %v460_v8 }
  0x23   :  { %285 = vmatpush.bf16.msra.mxu3 %v464_v9 }
  0x25   :  { %260 = vmatpush.bf16.msra.mxu1 %v440_v16  ;;  %244 = vmatpush.bf16.msra.mxu0 %v484_v24 }
  0x26   :  { %273 = vmatpush.bf16.msra.mxu2 %v444_v18 }
  0x27   :  { %286 = vmatpush.bf16.msra.mxu3 %v448_v19 }
  0x28   :  { %261 = vmatmul.bf16.vlgmr.msra.gmra.mxu1 %v31_v23 }
  0x29   :  { %355 = vmatpush.bf16.msrb.mxu1 %v600_v20  ;;  %274 = vmatmul.bf16.vlgmr.msra.gmra.mxu2 %v31_v23 }
  0x2a   :  { %369 = vmatpush.bf16.msrb.mxu2 %v600_v20  ;;  %287 = vmatmul.bf16.vlgmr.msra.gmra.mxu3 %v31_v23 }
  0x2b   :  { %383 = vmatpush.bf16.msrb.mxu3 %v600_v20  ;;  %245 = vmatpush.bf16.msra.mxu0 %v468_v28 }
  0x2d   :  { %356 = vmatpush.bf16.msrb.mxu1 %v599_v25 }
  0x2e   :  { %370 = vmatpush.bf16.msrb.mxu2 %v599_v25 }
  0x2f   :  { %384 = vmatpush.bf16.msrb.mxu3 %v599_v25  ;;  %246 = vmatpush.bf16.msra.mxu0 %v452_v32 }
  0x31   :  { %357 = vmatpush.bf16.msrb.mxu1 %v598_v29 }
  0x32   :  { %371 = vmatpush.bf16.msrb.mxu2 %v598_v29 }
  0x33   :  { %385 = vmatpush.bf16.msrb.mxu3 %v598_v29  ;;  %247 = vmatpush.bf16.msra.mxu0 %v436_v36 }
  0x35   :  { %358 = vmatpush.bf16.msrb.mxu1 %v597_v33 }
  0x36   :  { %372 = vmatpush.bf16.msrb.mxu2 %v597_v33  ;;  %248 = vmatmul.bf16.vlgmr.msra.gmra.mxu0 %v31_v23 }
  0x37   :  { %386 = vmatpush.bf16.msrb.mxu3 %v597_v33  ;;  %341 = vmatpush.bf16.msrb.mxu0 %v600_v20 }
  0x39   :  { %359 = vmatpush.bf16.msrb.mxu1 %v596_v37 }
  0x3a   :  { %373 = vmatpush.bf16.msrb.mxu2 %v596_v37 }
  0x3b   :  { %387 = vmatpush.bf16.msrb.mxu3 %v596_v37  ;;  %342 = vmatpush.bf16.msrb.mxu0 %v599_v25 }
  0x3d   :  { %360 = vmatpush.bf16.msrb.mxu1 %v595_v38 }
  0x3e   :  { %374 = vmatpush.bf16.msrb.mxu2 %v595_v38 }
  0x3f   :  { %388 = vmatpush.bf16.msrb.mxu3 %v595_v38  ;;  %343 = vmatpush.bf16.msrb.mxu0 %v598_v29 }
  0x41   :  { %361 = vmatpush.bf16.msrb.mxu1 %v594_v39 }
  0x42   :  { %375 = vmatpush.bf16.msrb.mxu2 %v594_v39 }
  0x43   :  { %389 = vmatpush.bf16.msrb.mxu3 %v594_v39  ;;  %344 = vmatpush.bf16.msrb.mxu0 %v597_v33 }
  0x45   :  { %362 = vmatpush.bf16.msrb.mxu1 %v593_v40 }
  0x46   :  { %376 = vmatpush.bf16.msrb.mxu2 %v593_v40 }
  0x47   :  { %345 = vmatpush.bf16.msrb.mxu0 %v596_v37  ;;  %390 = vmatpush.bf16.msrb.mxu3 %v593_v40 }
  0x4b   :  { %346 = vmatpush.bf16.msrb.mxu0 %v595_v38 }
  0x4f   :  { %347 = vmatpush.bf16.msrb.mxu0 %v594_v39 }
  0x53   :  { %348 = vmatpush.bf16.msrb.mxu0 %v593_v40 }
  0xa5   :  { %v262_v41 = vpop.f32.mrf.mxu1 }
  0xa6   :  { %v354_v42 = vpack.c.bf16 %v262_v41, %v262_v41 }
  0xa8   :  { %363 = vmatmul.bf16.vlgmr.msrb.gmra.mxu1 %v354_v42 }
  0xac   :  { %v275_v43 = vpop.f32.mrf.mxu2 }
  0xad   :  { %v288_v44 = vpop.f32.mrf.mxu3  ;;  %v368_v45 = vpack.c.bf16 %v275_v43, %v275_v43  ;;  %v264_v47 = vpop.f32.mrf.mxu1 }
  0xae   :  { %v382_v46 = vpack.c.bf16 %v288_v44, %v288_v44 }
  0xaf   :  { %377 = vmatmul.bf16.vlgmr.msrb.gmra.mxu2 %v368_v45 }
  0xb0   :  { %391 = vmatmul.bf16.vlgmr.msrb.gmra.mxu3 %v382_v46 }
  0xb3   :  { %v249_v50 = vpop.f32.mrf.mxu0 }
  0xb4   :  { %v277_v48 = vpop.f32.mrf.mxu2  ;;  %v292_v51 = vpack.c.bf16 %v249_v50, %v249_v50 }
  0xb5   :  { %v290_v49 = vpop.f32.mrf.mxu3 }
  0xb6   :  { %349 = vmatmul.bf16.vlgmr.msrb.gmra.mxu0 %v292_v51 }
  0xbb   :  { %v251_v52 = vpop.f32.mrf.mxu0 }
 0x125   :  { %v364_v53 = vpop.f32.mrf.mxu1 }
 0x126   :  { %397 = vrot.lane.b32.xlu0 %v364_v53, %s694_s1 }
 0x12d   :  { %v366_v54 = vpop.f32.mrf.mxu1 }
 0x132   :  { %v378_v55 = vpop.f32.mrf.mxu2 }
 0x133   :  { %v392_v56 = vpop.f32.mrf.mxu3  ;;  %401 = vrot.lane.b32.xlu0 %v378_v55, %s693_s18  ;;  %v350_v57 = vpop.f32.mrf.mxu0 }
 0x134   :  { %405 = vrot.lane.b32.xlu1 %v392_v56, %s695_s8 }
 0x13a   :  { %v380_v58 = vpop.f32.mrf.mxu2 }
 0x13b   :  { %v394_v59 = vpop.f32.mrf.mxu3  ;;  %v352_v60 = vpop.f32.mrf.mxu0 }
 0x198   :  { %v398_v61 = vpop.permute.xlu0 %397 }
 0x199   :  { %v409_v62 = vsel %vm408_vm0, %v350_v57, %v398_v61 }
 0x1a5   :  { %v402_v63 = vpop.permute.xlu0 %401 }
 0x1a6   :  { %v406_v0 = vpop.permute.xlu1 %405  ;;  %v411_v1 = vsel %vm410_vm1, %v409_v62, %v402_v63 }
 0x1a7   :  { %v413_v2 = vsel %vm412_vm2, %v411_v1, %v406_v0 }
 0x1a8   :  { %415 = vst.msk [vmem:[#allocation5] sm:$0xff] %vm414_vm3, %v413_v2 }
 0x1a9   :  { %426 = dma.vmem_to_hbm [thread:$0]  %s422_s10, 128, %s424_s13, [#allocation4]  }
 0x1aa   :  { %689 = dma.done.wait [#allocation4], 128  }
 0x1ab   :  { %690 = vsyncadd [#allocation4], 4294967168 }
 0x1ac   :  { %431 = vsyncpa [#allocation3], 1 }
 0x1ad   :  { %432 = vsyncpa [#allocation4], 1 }

</bundles_post_ra>
